<compile_context>
chip_gen: v7x
topology: tpu7x:2x2x1
jax: 0.10.0
libtpu: 0.0.40
codegen_flags: <defaults>
</compile_context>

<pallas_src>
import functools

import jax
import jax.numpy as jnp
from jax.experimental import pallas as pl
from jax.experimental.pallas import tpu as pltpu


def se_kernel(hw_real, x_ref, w1t_ref, w2t_ref, alpha_ref, out_ref):
    # x_ref:     (Bt, C, HWp)  input dtype (HWp = H*W padded to a multiple of 128)
    # w1t_ref:   (C, Cr)       f32  -- transpose of fc[0].weight (Cr, C)
    # w2t_ref:   (Cr, C)       f32  -- transpose of fc[2].weight (C, Cr)
    # alpha_ref: (1, 1)        f32 in SMEM -- shared PReLU slope (num_parameters=1)
    # out_ref:   (Bt, C, HWp)  input dtype
    xv = x_ref[...]

    # Squeeze: global average pool over the (lane) spatial axis, f32 accumulate.
    # Padded spatial lanes are zero, so the sum is exact; divide by the real HW.
    pooled = jnp.sum(xv, axis=-1, dtype=jnp.float32) * (1.0 / hw_real)      # (Bt, C)

    # Excite: fc1 -> PReLU -> fc2 -> sigmoid on the tiny (Bt, C)/(Bt, Cr) path.
    z = jnp.dot(pooled, w1t_ref[...], preferred_element_type=jnp.float32)   # (Bt, Cr)
    alpha = alpha_ref[0, 0]
    z = jnp.where(z > 0, z, alpha * z)                                      # PReLU
    s = jnp.dot(z, w2t_ref[...], preferred_element_type=jnp.float32)        # (Bt, C)
    s = pl.reciprocal(1.0 + jnp.exp(-s), approx=False)                      # sigmoid

    # Scale: broadcast per-(batch, channel) gate over spatial lanes, input dtype.
    gate = s.astype(xv.dtype)[:, :, None]                                   # (Bt, C, 1)
    out_ref[...] = (xv * gate).astype(out_ref.dtype)


def _pick_batch_tile(B, per_elem_bytes, target_bytes=2 << 20, min_steps=4):
    """Largest divisor of B whose (Bt, C, HWp) block stays <= target_bytes,
    backing off so the grid keeps >= min_steps steps when B allows it
    (v7x megacore sharding + prefetch/writeback overlap)."""
    divisors = [d for d in range(1, B + 1) if B % d == 0]
    fitting = [d for d in divisors if d * per_elem_bytes <= target_bytes] or [1]
    bt = max(fitting)
    while bt > 1 and (B // bt) < min_steps:
        smaller = [d for d in divisors if d < bt]
        if not smaller:
            break
        bt = max(smaller)
    return bt


def se_layer(x, w1, w2, prelu_alpha, *, block_target_bytes=2 << 20, donate_x=False):
    """x: (B, C, H, W); w1: (Cr, C); w2: (C, Cr); prelu_alpha: scalar."""
    B, C, H, W = x.shape
    HW = H * W
    Cr = w1.shape[0]

    # Lane-dense spatial axis: fold H*W into the last (lane) dim, pad to 128.
    HWp = ((HW + 127) // 128) * 128
    x3 = x.reshape(B, C, HW)
    if HWp != HW:
        x3 = jnp.pad(x3, ((0, 0), (0, 0), (0, HWp - HW)))  # zeros keep the pool exact

    dtype_bytes = jnp.dtype(x.dtype).itemsize
    per_elem_bytes = C * HWp * dtype_bytes
    Bt = _pick_batch_tile(B, per_elem_bytes, target_bytes=block_target_bytes)
    block_bytes = Bt * per_elem_bytes

    # in + out blocks, each double-buffered, plus weights and headroom; clamp
    # to a budget that is safe on v7x's 64 MiB physical VMEM (and above the
    # v5e 16 MiB scoped default so larger SE shapes still compile).
    vmem_limit = int(min(max(4 * block_bytes + (8 << 20), 32 << 20), 48 << 20))

    w1t = jnp.asarray(w1, jnp.float32).T               # (C, Cr)
    w2t = jnp.asarray(w2, jnp.float32).T               # (Cr, C)
    alpha = jnp.asarray(prelu_alpha, jnp.float32).reshape(1, 1)

    out3 = pl.pallas_call(
        functools.partial(se_kernel, HW),
        out_shape=jax.ShapeDtypeStruct((B, C, HWp), x.dtype),
        grid=(B // Bt,),
        in_specs=[
            pl.BlockSpec((Bt, C, HWp), lambda b: (b, 0, 0)),
            pl.BlockSpec((C, Cr), lambda b: (0, 0)),
            pl.BlockSpec((Cr, C), lambda b: (0, 0)),
            pl.BlockSpec(memory_space=pltpu.MemorySpace.SMEM),   # scalar PReLU slope
        ],
        out_specs=pl.BlockSpec((Bt, C, HWp), lambda b: (b, 0, 0)),
        compiler_params=pltpu.CompilerParams(
            dimension_semantics=("parallel",),
            vmem_limit_bytes=vmem_limit),
        input_output_aliases=({0: 0} if donate_x else {}),
    )(x3, w1t, w2t, alpha)

    if HWp != HW:
        out3 = out3[:, :, :HW]
    return out3.reshape(B, C, H, W)


def se_layer_ref(x, w1, w2, prelu_alpha):
    x32 = x.astype(jnp.float32)
    y = jnp.mean(x32, axis=(2, 3))                     # (B, C)
    z = y @ w1.T                                       # (B, Cr)
    z = jnp.where(z > 0, z, prelu_alpha * z)
    s = jax.nn.sigmoid(z @ w2.T)                       # (B, C)
    return (x32 * s[:, :, None, None]).astype(x.dtype)


if __name__ == "__main__":
    # Shapes consistent with the module: channel=32, reduction=16 -> Cr=2.
    reduction = 16
    prelu_alpha = 0.25                                  # nn.PReLU() default init
    key = jax.random.PRNGKey(0)

    # Main test: lane-dense spatial dim (16*16 = 256, already a multiple of 128).
    B, C, H, W = 2, 32, 16, 16
    Cr = C // reduction
    kx, k1, k2, kx2 = jax.random.split(key, 4)
    x = jax.random.normal(kx, (B, C, H, W), dtype=jnp.float32)
    bound1 = 1.0 / (C ** 0.5)
    bound2 = 1.0 / (Cr ** 0.5)
    w1 = jax.random.uniform(k1, (Cr, C), jnp.float32, -bound1, bound1)   # fc[0].weight
    w2 = jax.random.uniform(k2, (C, Cr), jnp.float32, -bound2, bound2)   # fc[2].weight

    out = se_layer(x, w1, w2, prelu_alpha)
    out = jax.block_until_ready(out)
    ref = se_layer_ref(x, w1, w2, prelu_alpha)
    assert out.shape == x.shape and out.dtype == x.dtype
    assert jnp.allclose(out, ref, atol=1e-5, rtol=1e-5), "mismatch vs reference"

    # Secondary check: non-multiple-of-128 spatial dim (7*7 = 49) exercises the
    # lane-padding path typical of real SE stages.
    x_small = jax.random.normal(kx2, (B, C, 7, 7), dtype=jnp.float32)
    out_small = jax.block_until_ready(se_layer(x_small, w1, w2, prelu_alpha))
    ref_small = se_layer_ref(x_small, w1, w2, prelu_alpha)
    assert out_small.shape == x_small.shape
    assert jnp.allclose(out_small, ref_small, atol=1e-5, rtol=1e-5), "padded-path mismatch"

    print("KERNEL_OK")
</pallas_src>

<mosaic_0001>
module attributes {stable_mosaic.version = 11 : i64} {
  func.func @se_kernel(%arg0: i32, %arg1: memref<1x32x256xf32, #tpu.memory_space<vmem>>, %arg2: memref<32x2xf32, #tpu.memory_space<vmem>>, %arg3: memref<2x32xf32, #tpu.memory_space<vmem>>, %arg4: memref<1x1xf32, #tpu.memory_space<smem>>, %arg5: memref<1x32x256xf32, #tpu.memory_space<vmem>>) attributes {dimension_semantics = [#tpu.dimension_semantics<parallel>], iteration_bounds = array<i64: 2>, scalar_prefetch = 0 : i64, scratch_operands = 0 : i64, tpu.core_type = #tpu.core_type<tc>, window_params = [{transform_indices = @transform_0, window_bounds = array<i64: 1, 32, 256>}, {pipeline_mode = #tpu.pipeline_mode<synchronous>, transform_indices = @transform_1, window_bounds = array<i64: 32, 2>}, {pipeline_mode = #tpu.pipeline_mode<synchronous>, transform_indices = @transform_2, window_bounds = array<i64: 2, 32>}, {transform_indices = @transform_3, window_bounds = array<i64: 1, 1>}, {transform_indices = @transform_4, window_bounds = array<i64: 1, 32, 256>}]} {
    %c0 = arith.constant 0 : index
    %c0_0 = arith.constant 0 : index
    %c0_1 = arith.constant 0 : index
    %0 = vector.load %arg1[%c0, %c0_0, %c0_1] : memref<1x32x256xf32, #tpu.memory_space<vmem>>, vector<1x32x256xf32>
    %cst = arith.constant dense<0.000000e+00> : vector<1x32xf32>
    %1 = vector.multi_reduction <add>, %0, %cst [2] : vector<1x32x256xf32> to vector<1x32xf32>
    %cst_2 = arith.constant 3.906250e-03 : f32
    %2 = vector.broadcast %cst_2 : f32 to vector<1x32xf32>
    %3 = arith.mulf %1, %2 : vector<1x32xf32>
    %c0_3 = arith.constant 0 : index
    %c0_4 = arith.constant 0 : index
    %4 = vector.load %arg2[%c0_3, %c0_4] : memref<32x2xf32, #tpu.memory_space<vmem>>, vector<32x2xf32>
    %cst_5 = arith.constant dense<0.000000e+00> : vector<1x2xf32>
    %5 = tpu.matmul %3, %4, %cst_5 {dimension_numbers = #tpu.dot_dimension_numbers<[1], [0], [0], [1], [0, 0, 1, 1], [], []>} : vector<1x32xf32>, vector<32x2xf32>, vector<1x2xf32> -> vector<1x2xf32>
    %c0_6 = arith.constant 0 : index
    %c0_7 = arith.constant 0 : index
    %6 = memref.load %arg4[%c0_6, %c0_7] : memref<1x1xf32, #tpu.memory_space<smem>>
    %cst_8 = arith.constant 0.000000e+00 : f32
    %7 = vector.broadcast %cst_8 : f32 to vector<1x2xf32>
    %8 = arith.cmpf ogt, %5, %7 : vector<1x2xf32>
    %9 = vector.broadcast %6 : f32 to vector<1x2xf32>
    %10 = arith.mulf %9, %5 : vector<1x2xf32>
    %11 = arith.select %8, %5, %10 : vector<1x2xi1>, vector<1x2xf32>
    %c0_9 = arith.constant 0 : index
    %c0_10 = arith.constant 0 : index
    %12 = vector.load %arg3[%c0_9, %c0_10] : memref<2x32xf32, #tpu.memory_space<vmem>>, vector<2x32xf32>
    %cst_11 = arith.constant dense<0.000000e+00> : vector<1x32xf32>
    %13 = tpu.matmul %11, %12, %cst_11 {dimension_numbers = #tpu.dot_dimension_numbers<[1], [0], [0], [1], [0, 0, 1, 1], [], []>} : vector<1x2xf32>, vector<2x32xf32>, vector<1x32xf32> -> vector<1x32xf32>
    %cst_12 = arith.constant 0.000000e+00 : f32
    %14 = vector.broadcast %cst_12 : f32 to vector<1x32xf32>
    %15 = arith.subf %14, %13 : vector<1x32xf32>
    %16 = math.exp %15 : vector<1x32xf32>
    %cst_13 = arith.constant 1.000000e+00 : f32
    %17 = vector.broadcast %cst_13 : f32 to vector<1x32xf32>
    %18 = arith.addf %17, %16 : vector<1x32xf32>
    %19 = tpu.reciprocal %18 : vector<1x32xf32> -> vector<1x32xf32>
    %20 = vector.shape_cast %19 : vector<1x32xf32> to vector<1x32x1xf32>
    %21 = vector.broadcast %20 : vector<1x32x1xf32> to vector<1x32x256xf32>
    %22 = arith.mulf %0, %21 : vector<1x32x256xf32>
    %c0_14 = arith.constant 0 : index
    %c0_15 = arith.constant 0 : index
    %c0_16 = arith.constant 0 : index
    %23 = vector.load %arg5[%c0_14, %c0_15, %c0_16] : memref<1x32x256xf32, #tpu.memory_space<vmem>>, vector<1x32x256xf32>
    tpu.vector_store %arg5[%c0_14, %c0_15, %c0_16], %22 {strides = array<i32>} : memref<1x32x256xf32, #tpu.memory_space<vmem>>, vector<1x32x256xf32>,
    return
  }
  func.func @transform_0(%arg0: i32) -> (i32, i32, i32) {
    %c0_i32 = arith.constant 0 : i32
    %c0_i32_0 = arith.constant 0 : i32
    %c0_i32_1 = arith.constant 0 : i32
    return %arg0, %c0_i32, %c0_i32_0 : i32, i32, i32
  }
  func.func @transform_1(%arg0: i32) -> (i32, i32) {
    %c0_i32 = arith.constant 0 : i32
    %c0_i32_0 = arith.constant 0 : i32
    %c0_i32_1 = arith.constant 0 : i32
    return %c0_i32, %c0_i32_0 : i32, i32
  }
  func.func @transform_2(%arg0: i32) -> (i32, i32) {
    %c0_i32 = arith.constant 0 : i32
    %c0_i32_0 = arith.constant 0 : i32
    %c0_i32_1 = arith.constant 0 : i32
    return %c0_i32, %c0_i32_0 : i32, i32
  }
  func.func @transform_3(%arg0: i32) -> (i32, i32) {
    %c0_i32 = arith.constant 0 : i32
    %c0_i32_0 = arith.constant 0 : i32
    %c0_i32_1 = arith.constant 0 : i32
    return %c0_i32, %c0_i32_0 : i32, i32
  }
  func.func @transform_4(%arg0: i32) -> (i32, i32, i32) {
    %c0_i32 = arith.constant 0 : i32
    %c0_i32_0 = arith.constant 0 : i32
    %c0_i32_1 = arith.constant 0 : i32
    return %arg0, %c0_i32, %c0_i32_0 : i32, i32, i32
  }
}

</mosaic_0001>

<bundles_post_ra>
// kernel: tpu_custom_call.1
= control target key start
LH: loop header
LB: loop body
LE: loop exit
PB: predicated region body
PF: predicated region fallthrough
CT: control target
= control target key end

     0   :  { %s1013_s0 = inlined_call_operand.hbm [shape: f32[2,32,256], index: 0, kind: input, shape index: {}]   ;;  %s1014_s1 = inlined_call_operand.vmem [shape: f32[32,2], index: 1, kind: input, shape index: {}]   ;;  %s1015_s2 = inlined_call_operand.vmem [shape: f32[2,32], index: 2, kind: input, shape index: {}]   ;;  %s1016_s3 = inlined_call_operand.<no memory space> [shape: f32[1,1], index: 3, kind: input, shape index: {}]   ;;  %s1017_s4 = inlined_call_operand.hbm [shape: f32[2,32,256], index: 4, kind: output, shape index: {}]  }
   0x1   :  { %9 = sst [smem:[#allocation2]] %s1016_s3 }
   0x2   :  { %10 = vsyncpa [#allocation4], 0 }
   0x3   :  { %12 = vsyncpa [#allocation4 + $0x1], 0 }
   0x4   :  { %13 = vsyncpa [#allocation5], 0 }
   0x5   :  { %15 = vsyncpa [#allocation5 + $0x1], 0  ;;  %s800_s17 = smov 0   ;;  %s802_s18 = smov 0  }
   0x6   :  { %s804_s19 = smov 0   ;;  %s806_s20 = smov 0  }
   0x7 LB: > { %s821_s3 = sadd.s32 4294967295, %s761_s20   ;;  %s560_s21 = sadd.s32 4294967294, %s761_s20   ;;  %s761_s20 = sphi %s806_s20, %s1030_s20   ;;  %s757_s19 = sphi %s804_s19, %s1029_s19   ;;  %s753_s18 = sphi %s802_s18, %s1028_s18   ;;  %s749_s17 = sphi %s800_s17, %s1027_s17  }
   0x8   : > { %s825_s22 = sadd.s32 1, %s761_s20   ;;  %s28_s23 = sadd.s32 1, %s757_s19 }
   0x9   : > { %s25_s24 = ssub.s32 %s761_s20, %s825_s22  ;;  %p35_p0 = scmp.ne.s32.totalorder %s757_s19, %s753_s18 }
   0xa   : > { %p26_p1 = scmp.eq.s32.totalorder %s25_s24, 0  ;;  %p36_p2 = scmp.eq.s32.totalorder %s761_s20, 0 }
   0xb   : > { %p41_p3 = scmp.ne.s32.totalorder %s753_s18, %s749_s17  ;;  %p42_p4 = scmp.eq.s32.totalorder %s821_s3, 0 }
   0xc   : > { %s837_s25 = scalar_select %p26_p1, %s757_s19, %s28_s23  }
   0xd   : > { %p839_p5 = por %p36_p2, %p35_p0  ;;  %p843_p6 = por %p42_p4, %p41_p3 }
   0xe   : > { %p128_p7 = scmp.eq.s32.totalorder %s821_s3, 1  ;;  %p134_p8 = scmp.eq.s32.totalorder %s560_s21, 1 }
   0xf   : > { %p620_p10 = scmp.lt.s32.totalorder %s761_s20, 2  ;;  %s163_s30 = sand.u32 1, %s757_s19  }
  0x10   : > { %p850_p11 = por %p128_p7, %p35_p0  ;;  %p854_p12 = por %p134_p8, %p41_p3 }
  0x11   : > { %s577_s5 = sshll.u32 %s761_s20, 10  ;;  %s563_s6 = sshll.u32 %s163_s30, 6 }
  0x12   : > { %s1021_s28 = scalar_select %p850_p11, 1, 0 }
  0x13   : > { %s1022_s29 = scalar_select %p854_p12, 1, 0 }
  0x14   : > { %s863_s9 = scalar_lea.hbm %s1013_s0, %s577_s5  ;;  %s167_s10 = scalar_lea.vmem [#allocation3], %s563_s6 }
  0x15   : > { %s174_s11 = sshll.u32 %s167_s10, 4  ;;  %p867_p13 = pnand %p620_p10, %p839_p5  ;;  %s871_s11 = int_to_ptr.vmem [resolvable:$true] %s174_s11 }
  0x16   : > { %s873_s13 = scalar_lea.sflag [#allocation4], %s163_s30  ;;  %s665_s14 = scalar_lea.hbm %s863_s9, 1024 }
  0x17   : > { %p666_p0 = scmp.ne.s32.totalorder %s863_s9, %s665_s14  ;;  %p667_p1 = pneg %p867_p13 }
  0x18   : > { %s670_s21 = scalar_lea.hbm %s1013_s0, 2048  ;;  %p671_p4 = scmp.lt.u32.totalorder %s863_s9, %s1013_s0 }
  0x19   : > { %p668_p2 = pnand %p667_p1, %p666_p0  ;;  %p672_p5 = scmp.lt.u32.totalorder %s670_s21, %s665_s14 }
  0x1a   : > { %p674_p8 = scmp.lt.u32.totalorder %s665_s14, %s863_s9 }
  0x1b   : > { %p669_p3 = pneg %p668_p2  ;;  %p673_p7 = por %p672_p5, %p671_p4 }
  0x1d   : > { %p675_p10 = por %p674_p8, %p673_p7 }
  0x1f   : > { %p676_p9 = pnand %p675_p10, %p669_p3 }
  0x21   : > { %679 = shalt.err (!%p676_p9)
}
  0x22   : > { %s680_s26 = scalar_lea.vmem %s871_s11, 1024  ;;  %s763_s30 = smov [#allocation3]  }
  0x23   : > { %p681_p0 = scmp.ne.s32.totalorder %s871_s11, %s680_s26  ;;  %s685_s5 = sshll.u32 %s763_s30, 4  ;;  %s686_s5 = int_to_ptr.vmem [resolvable:$false] %s685_s5 }
  0x24   : > { %s687_s6 = scalar_lea.vmem %s686_s5, 2048  ;;  %p688_p11 = scmp.lt.s32.totalorder %s871_s11, %s686_s5 }
  0x25   : > { %p683_p2 = pnand %p681_p0, %p667_p1  ;;  %p689_p4 = scmp.lt.s32.totalorder %s687_s6, %s680_s26 }
  0x27   : > { %p684_p12 = pneg %p683_p2  ;;  %p690_p5 = por %p689_p4, %p688_p11 }
  0x29   : > { %p691_p7 = pnand %p690_p5, %p684_p12 }
  0x2b   : > { %694 = shalt.err (!%p691_p7)
}
  0x2c   : > { %s764_s7 = smov 256   ;;  %s765_s8 = smov 16  }
  0x2d   : > { %615 = dma.hbm_to_vmem [thread:$0]  (!%p867_p13), %s863_s9, 1024, %s871_s11, %s873_s13, %s764_s7, %s764_s7, %s765_s8  }
  0x2e   : > { %p566_p9 = scmp.ge.s32.totalorder %s761_s20, 1  ;;  %p182_p1 = scmp.lt.s32.totalorder %s761_s20, 3 }
  0x30   : > { %p183_p3 = pnand %p566_p9, %p182_p1 }
  0x31   : > { %s904_s10 = sand.u32 (!%p183_p3), 1, %s753_s18  }
  0x32   : > { %186 = sbr.rel (%p183_p3) target bundleno = 811 (0x32b), region = 36  ;;  %s567_s14 = sshll.u32 (!%p183_p3), %s904_s10, 6 }
  0x33   : > { %s189_s15 = scalar_lea.sflag (!%p183_p3), [#allocation4], %s904_s10  ;;  %s192_s16 = scalar_lea.vmem (!%p183_p3), [#allocation3], %s567_s14 }
  0x39   : > { %740 = dma.done.wait (%p843_p6), %s189_s15, 1024  }
  0x3a   : > { %742 = vsyncadd (%p843_p6), %s189_s15, 4294966272  ;;  %v914_v0 = vld [vmem:[%s192_s16] sm:$0xff]  ;;  %v916_v1 = vld [vmem:[%s192_s16 + $0x8] sm:$0xff]  ;;  %v766_v15 = vmov 0.0|0.0   ;;  %vm767_vm0 = vmmov 0   ;;  %v768_v19 = vmov 0.0   ;;  %v249_v20 = vlaneseq }
  0x3b   : > { %v918_v2 = vld [vmem:[%s192_s16 + $0x20] sm:$0xff]  ;;  %v225_v3 = vadd.f32 %v916_v1, %v914_v0  ;;  %v922_v4 = vld [vmem:[%s192_s16 + $0x28] sm:$0xff]  ;;  %v924_v5 = vld [vmem:[%s192_s16 + $0x10] sm:$0xff]  ;;  %602 = vmatprep.subr.bf16.mxu0 %v766_v15  ;;  %594 = vmatprep.mubr.msk.f32.mxu0 %vm767_vm0, %v768_v19  ;;  %vm260_vm1 = vcmask 130112   ;;  %vm267_vm2 = vcmask 195712   ;;  %vm274_vm3 = vcmask 261312  }
  0x3c   : > { %v926_v6 = vld [vmem:[%s192_s16 + $0x18] sm:$0xff]  ;;  %v231_v7 = vadd.f32 %v922_v4, %v918_v2  ;;  %v930_v8 = vld [vmem:[%s192_s16 + $0x30] sm:$0xff]  ;;  %v241_v12 = vld [vmem:[%s1014_s1] sm:$0xff]  ;;  %597 = vmatprep.subr.mxu1 %v768_v19  ;;  %599 = vmatprep.mubr.msk.f32.mxu1 %vm767_vm0, %v768_v19  ;;  %v250_v21 = vand.u32 127, %v249_v20  ;;  %v252_v22 = vshrl.u32 %v249_v20, 7  ;;  %vm276_vm4 = vcmask 261120  }
  0x3d   : > { %v932_v9 = vld [vmem:[%s192_s16 + $0x38] sm:$0xff]  ;;  %226 = vadd.xlane.f32.xlu0 %v225_v3  ;;  %v228_v10 = vadd.f32 %v926_v6, %v924_v5  ;;  %v242_v13 = vld [vmem:[%s1014_s1 + $0x8] sm:$0xff]  ;;  %v243_v16 = vld [vmem:[%s1014_s1 + $0x10] sm:$0xff]  ;;  %vm359_vm5 = vcmask 1041408   ;;  %s349_s5 = sld [smem:[#allocation2]]  ;;  %vm355_vm7 = vcmask 15360  }
  0x3e   : > { %232 = vadd.xlane.f32.xlu1 %v231_v7  ;;  %v234_v11 = vadd.f32 %v932_v9, %v930_v8  ;;  %v603_v14 = vpack.c.bf16 %v242_v13, %v241_v12  ;;  %v244_v17 = vld [vmem:[%s1014_s1 + $0x18] sm:$0xff]  ;;  %v255_v23 = vadd.s32 4294967288, %v250_v21  ;;  %v262_v25 = vadd.s32 4294967280, %v250_v21  ;;  %v354_v45 = vld [vmem:[%s1015_s2] sm:$0x3]  ;;  %s216_s6 = scalar_lea.vmem [#allocation6], %s567_s14 }
  0x3f   : > { %v606_v18 = vpack.c.bf16 %v244_v17, %v243_v16  ;;  %v269_v26 = vadd.s32 4294967272, %v250_v21  ;;  %v253_v28 = vsub.s32 %v250_v21, %v252_v22  ;;  %598 = vmatpush3.msk.msra.mxu1 %vm359_vm5, %v354_v45  ;;  %v440_v57 = vsub.s32 0, %v252_v22  ;;  %s487_s7 = sshll.u32 %s216_s6, 4  ;;  %s578_s8 = sshll.u32 %s821_s3, 10  ;;  %s962_s7 = int_to_ptr.vmem [resolvable:$true] %s487_s7 }
  0x40   : > { %604 = vmatpush3.bf16.msra.mxu0 %v603_v14  ;;  %v258_v30 = vsub.s32 %v255_v23, %v252_v22  ;;  %v265_v31 = vsub.s32 %v262_v25, %v252_v22  ;;  %s967_s16 = scalar_lea.hbm %s1017_s4, %s578_s8  ;;  %s474_s3 = scalar_lea.sflag [#allocation5], %s904_s10 }
  0x41   : > { %229 = vadd.xlane.f32.xlu0 %v228_v10  ;;  %605 = vmatprep.subr.bf16.mxu0 %v766_v15  ;;  %v272_v34 = vsub.s32 %v269_v26, %v252_v22  ;;  %s695_s27 = scalar_lea.vmem %s962_s7, 1024  ;;  %p1024_p11 = scmp.ne.s32.totalorder %s1021_s28, 0 }
  0x42   : > { %235 = vadd.xlane.f32.xlu1 %v234_v11  ;;  %p696_p6 = scmp.ne.s32.totalorder %s962_s7, %s695_s27  ;;  %s769_s9 = smov [#allocation6]  }
  0x43   : > { %v351_v46 = vstv %s349_s5  ;;  %s699_s11 = sshll.u32 %s769_s9, 4  ;;  %s700_s11 = int_to_ptr.vmem [resolvable:$false] %s699_s11 }
  0x44   : > { %607 = vmatpush3.bf16.msra.mxu0 %v606_v18  ;;  %p697_p12 = pnand %p696_p6, %p1024_p11  ;;  %s701_s12 = scalar_lea.vmem %s700_s11, 2048 }
  0x45   : > { %p702_p8 = scmp.lt.s32.totalorder %s962_s7, %s700_s11  ;;  %p703_p10 = scmp.lt.s32.totalorder %s701_s12, %s695_s27 }
  0x46   : > { %p698_p13 = pneg %p697_p12 }
  0x47   : > { %p704_p0 = por %p703_p10, %p702_p8 }
  0x49   : > { %p705_p2 = pnand %p704_p0, %p698_p13 }
  0xca   : > { %v227_v24 = vpop.xlane.xlu0 %226 }
  0xcb   : > { %v233_v27 = vpop.xlane.xlu1 %232  ;;  %v237_v29 = vmul.f32 0.00390625, %v227_v24 }
  0xcc   : > { %v239_v32 = vmul.f32 0.00390625, %v233_v27 }
  0xcd   : > { %v254_v38 = vrot.slane %v237_v29, %v253_v28 }
  0xce   : > { %v230_v33 = vpop.xlane.xlu0 %229  ;;  %v266_v40 = vrot.slane %v239_v32, %v265_v31 }
  0xcf   : > { %v238_v35 = vmul.f32 0.00390625, %v230_v33  ;;  %v236_v36 = vpop.xlane.xlu1 %235 }
  0xd0   : > { %v240_v37 = vmul.f32 0.00390625, %v236_v36 }
  0xd1   : > { %v259_v39 = vrot.slane %v238_v35, %v258_v30 }
  0xd2   : > { %v273_v41 = vrot.slane %v240_v37, %v272_v34 }
  0xd3   : > { %v261_v42 = vsel %vm260_vm1, %v259_v39, %v254_v38 }
  0xd4   : > { %v268_v43 = vsel %vm267_vm2, %v266_v40, %v261_v42 }
  0xd5   : > { %v275_v44 = vsel %vm274_vm3, %v273_v41, %v268_v43 }
  0xd6   : > { %595 = vmatmul.mubr.msk.f32.vlgmr.msra.gmra.mrb[0].mxu0 %vm276_vm4, %v275_v44 }
 0x1a9   : > { %v345_v47 = vpop.f32.mrb[0].mxu0 }
 0x1aa   : > { %vm350_vm6 = vcmp.gt.f32.partialorder %v345_v47, 0.0  ;;  %v352_v48 = vmul.f32 %v351_v46, %v345_v47  ;;  %v596_v49 = vpop.f32.mrb[1].mxu0 }
 0x1ac   : > { %v353_v50 = vsel %vm350_vm6, %v345_v47, %v352_v48 }
 0x1ad   : > { %600 = vmatmul.mubr.msk.f32.vlgmr.msra.gmra.mrb[0].mxu1 %vm355_vm7, %v353_v50 }
 0x280   : > { %v429_v51 = vpop.f32.mrb[0].mxu1 }
 0x281   : > { %v433_v52 = vsub.f32 0.0, %v429_v51  ;;  %v601_v53 = vpop.f32.mrb[1].mxu1 }
 0x283   : > { %v434_v54 = vmul.f32 1.442695, %v433_v52 }
 0x285   : > { %661 = vpow2.f32 %v434_v54 }
 0x28f   : > { %v662_v55 = vpop.eup %661 }
 0x290   : > { %v436_v56 = vadd.f32 1.0, %v662_v55 }
 0x292   : > { %663 = vrcp.f32 %v436_v56 }
 0x29c   : > { %v664_v58 = vpop.eup %663 }
 0x29d   : > { %v441_v59 = vrot.slane %v664_v58, %v440_v57 }
 0x29f   : > { %447 = vbcast.lane.b32.xlu1 %v441_v59, 264  ;;  %443 = vbcast.lane.b32.xlu0 %v441_v59, 256 }
 0x2a3   : > { %451 = vbcast.lane.b32.xlu1 %v441_v59, 272 }
 0x2a7   : > { %455 = vbcast.lane.b32.xlu1 %v441_v59, 280 }
 0x311   : > { %v448_v60 = vpop.permute.xlu1 %447  ;;  %v444_v61 = vpop.permute.xlu0 %443 }
 0x312   : > { %v459_v62 = vmul.f32 %v448_v60, %v924_v5  ;;  %v460_v63 = vmul.f32 %v448_v60, %v926_v6  ;;  %v457_v3 = vmul.f32 %v444_v61, %v914_v0  ;;  %v458_v7 = vmul.f32 %v444_v61, %v916_v1 }
 0x314   : > { %467 = vst [vmem:[%s216_s6 + $0x10] sm:$0xff] %v459_v62  ;;  %468 = vst [vmem:[%s216_s6 + $0x18] sm:$0xff] %v460_v63 }
 0x315   : > { %465 = vst [vmem:[%s216_s6] sm:$0xff] %v457_v3  ;;  %466 = vst [vmem:[%s216_s6 + $0x8] sm:$0xff] %v458_v7  ;;  %v452_v10 = vpop.permute.xlu1 %451 }
 0x316   : > { %v461_v11 = vmul.f32 %v452_v10, %v918_v2  ;;  %v462_v5 = vmul.f32 %v452_v10, %v922_v4 }
 0x318   : > { %469 = vst [vmem:[%s216_s6 + $0x20] sm:$0xff] %v461_v11  ;;  %470 = vst [vmem:[%s216_s6 + $0x28] sm:$0xff] %v462_v5 }
 0x319   : > { %v456_v0 = vpop.permute.xlu1 %455 }
 0x31a   : > { %v463_v1 = vmul.f32 %v456_v0, %v930_v8  ;;  %v464_v2 = vmul.f32 %v456_v0, %v932_v9 }
 0x31c   : > { %471 = vst [vmem:[%s216_s6 + $0x30] sm:$0xff] %v463_v1  ;;  %472 = vst [vmem:[%s216_s6 + $0x38] sm:$0xff] %v464_v2 }
 0x31d   : > { %708 = shalt.err (!%p705_p2)
}
 0x31e   : > { %s709_s13 = scalar_lea.hbm %s967_s16, 1024  ;;  %s713_s24 = scalar_lea.hbm %s1017_s4, 2048 }
 0x31f   : > { %p710_p4 = scmp.ne.s32.totalorder %s967_s16, %s709_s13  ;;  %p714_p9 = scmp.lt.u32.totalorder %s967_s16, %s1017_s4 }
 0x320   : > { %p715_p1 = scmp.lt.u32.totalorder %s713_s24, %s709_s13  ;;  %p717_p6 = scmp.lt.u32.totalorder %s709_s13, %s967_s16 }
 0x321   : > { %p711_p5 = pnand %p710_p4, %p1024_p11 }
 0x322   : > { %p716_p3 = por %p715_p1, %p714_p9 }
 0x323   : > { %p712_p7 = pneg %p711_p5 }
 0x324   : > { %p718_p12 = por %p717_p6, %p716_p3 }
 0x326   : > { %p719_p13 = pnand %p718_p12, %p712_p7 }
 0x328   : > { %722 = shalt.err (!%p719_p13)
}
 0x329   : > { %s770_s5 = smov 256   ;;  %s771_s6 = smov 16  }
 0x32a   : > { %610 = dma.vmem_to_hbm [thread:$0]  (%p1024_p11), %s962_s7, 1024, %s967_s16, %s474_s3, %s770_s5, %s770_s5, %s771_s6  }
 0x32b PF: > { %s502_s8 = sand.u32 1, %s749_s17   ;;  %p1025_p8 = scmp.ne.s32.totalorder %s1022_s29, 0 }
 0x32c   : > { %p1026_p10 = scmp.ge.s32.totalorder %s761_s20, 2  ;;  %s503_s14 = scalar_lea.sflag [#allocation5], %s502_s8 }
 0x32e   : > { %p617_p0 = pnand %p1026_p10, %p1025_p8 }
 0x330   : > { %744 = dma.done.wait (!%p617_p0), %s503_s14, 1024  }
 0x331   : > { %746 = vsyncadd (!%p617_p0), %s503_s14, 4294966272  ;;  %p18_p2 = scmp.ge.s32.totalorder %s825_s22, 4   ;;  %s1027_s17 = smov %s753_s18 }
 0x332   : > { %s1028_s18 = smov %s757_s19  ;;  %s1029_s19 = smov %s837_s25 }
 0x333   : > { %s1030_s20 = smov %s825_s22  ;;  %20 = sbr.rel (!%p18_p2) target bundleno = 7 (0x7), region = 81 }
 0x33a   :  { %508 = vsyncpa [#allocation4], 1 }
 0x33b   :  { %510 = vsyncpa [#allocation4 + $0x1], 1 }
 0x33c   :  { %511 = vsyncpa [#allocation5], 1 }
 0x33d   :  { %513 = vsyncpa [#allocation5 + $0x1], 1 }

</bundles_post_ra>
